<compile_context>
chip_gen: v7x
topology: tpu7x:2x2x1
jax: 0.10.0
libtpu: 0.0.40
codegen_flags: <defaults>
</compile_context>

<pallas_src>
import math

import jax
import jax.numpy as jnp
from jax.experimental import pallas as pl
from jax.experimental.pallas import tpu as pltpu


# ------------------------------ helpers ------------------------------------

def _round_up(n, m):
    return ((n + m - 1) // m) * m


_ACTIVATIONS = {
    "tanh": jnp.tanh,
    "relu": lambda v: jnp.maximum(v, 0.0),
    "sigmoid": jax.nn.sigmoid,
}


def _pick_elementwise_dtype(param_dtype):
    """bf16 VPU/EUP is native on v6e/v7x; elsewhere keep elementwise math in f32.

    This is a pure performance choice: Mosaic lowers bf16 elementwise correctly
    on every generation, so a wrong guess here only costs speed, never accuracy.
    """
    if jnp.dtype(param_dtype) != jnp.dtype(jnp.bfloat16):
        return jnp.dtype(jnp.float32)
    try:
        kind = jax.devices()[0].device_kind.lower()
    except Exception:  # pragma: no cover - defensive
        kind = ""
    if ("v6" in kind) or ("v7" in kind):
        return jnp.dtype(jnp.bfloat16)
    return jnp.dtype(jnp.float32)


# ----------------------------- Pallas kernel -------------------------------

def _make_backbone_kernel(n_layers, activation, mxu_dtype, ew_dtype):
    """Fused backbone: (Linear -> act [-> dropout])* -> Linear.

    Kernel signature: (x_ref, w0, b0, w1, b1, ..., o_ref).
      * matmuls run on the MXU in `mxu_dtype` with f32 accumulation,
      * bias add + activation run in `ew_dtype` (bf16 on v6e/v7x, f32 on v5e),
      * final bias add stays f32; store casts to the output ref dtype.
    Weight output dims are pre-padded to multiples of 128 (lane-dense); the
    first contraction dim equals the unpadded input width, so x streams as-is.
    """
    act = _ACTIVATIONS[activation]

    def kernel(*refs):
        x_ref, o_ref = refs[0], refs[-1]
        h = x_ref[...]
        if h.dtype != mxu_dtype:
            h = h.astype(mxu_dtype)
        for l in range(n_layers):
            w_ref = refs[1 + 2 * l]
            b_ref = refs[2 + 2 * l]
            y = jnp.dot(h, w_ref[...],                       # MXU, f32 acc
                        preferred_element_type=jnp.float32)
            if l < n_layers - 1:
                y = y.astype(ew_dtype) + b_ref[...]          # VPU
                y = act(y)                                    # EUP/VPU
                # TODO(synk): backbone_dropout > 0 in training mode would need
                # pltpu.prng_random_bits masking; this path is eval / rate 0.0.
                h = y.astype(mxu_dtype) if y.dtype != mxu_dtype else y
            else:
                h = y + b_ref[...].astype(jnp.float32)        # final bias in f32
        o_ref[...] = h.astype(o_ref.dtype)

    return kernel


def backbone_forward_pallas(x, padded_params, out_dim, activation="tanh",
                            mxu_dtype=jnp.bfloat16, ew_dtype=jnp.float32,
                            out_dtype=None, max_batch_tile=1024,
                            grid_free_max_rows=256):
    """Run the fused backbone; slice the padded output columns back.

    padded_params: list of (w [Kin, Doutp], b [1, Doutp]) where Doutp is a
    multiple of 128, layer-0 Kin equals the *unpadded* input width (so x needs
    no feature padding), and later Kin equals the previous padded Doutp.
    """
    B, Din = x.shape
    n_layers = len(padded_params)
    assert padded_params[0][0].shape[0] == Din
    dLp = padded_params[-1][0].shape[1]
    assert out_dim <= dLp
    if out_dtype is None:
        out_dtype = x.dtype

    flat_params = [t for wb in padded_params for t in wb]
    weight_bytes = sum(int(t.size) * t.dtype.itemsize for t in flat_params)

    # Advisory cost estimate so XLA can schedule around this small custom call.
    dims = [Din] + [w.shape[1] for w, _ in padded_params]
    flops = sum(2 * B * dims[l] * dims[l + 1] for l in range(n_layers))
    transcendentals = B * sum(dims[1:-1]) if activation in ("tanh", "sigmoid") else 0
    bytes_accessed = int(x.size * x.dtype.itemsize + weight_bytes
                         + B * dLp * jnp.dtype(out_dtype).itemsize)
    cost = pl.CostEstimate(flops=int(flops), transcendentals=int(transcendentals),
                           bytes_accessed=bytes_accessed)

    kernel = _make_backbone_kernel(n_layers, activation, mxu_dtype, ew_dtype)
    out_shape = jax.ShapeDtypeStruct((B, dLp), out_dtype)

    if B <= grid_free_max_rows:
        # Small batch: single grid-free invocation; everything (x, weights, out)
        # is explicitly VMEM-resident, no per-step grid overhead.
        vmem_spec = pl.BlockSpec(memory_space=pltpu.MemorySpace.VMEM)
        out_p = pl.pallas_call(
            kernel,
            out_shape=out_shape,
            in_specs=[vmem_spec] * (1 + len(flat_params)),
            out_specs=vmem_spec,
            cost_estimate=cost,
        )(x, *flat_params)
        return out_p[:, :out_dim]

    # ---------------- gridded, batch-tiled path -----------------------------
    # Weights/biases are VMEM-resident (constant index_map); only x / out tiles
    # stream.  Keep >= 2 grid steps so ("parallel",) can shard the batch across
    # v7x's 2 TensorCores.  A partial last tile is safe: every output row only
    # depends on its own input row, OOB rows read garbage but are never written
    # back (the writeback DMA is clamped to the array bounds).
    bt = min(max_batch_tile, _round_up(pl.cdiv(B, 2), 16))
    grid = (pl.cdiv(B, bt),)

    if 2 * weight_bytes > (40 << 20):
        # TODO(synk): very wide backbones need a K/N grid axis ("arbitrary")
        # with an f32 VMEM accumulator instead of whole-weight VMEM residency
        # (v7x has only 64 MiB VMEM).  Not needed at these sizes.
        raise ValueError("backbone weights too large for the VMEM-resident path")

    x_tile_bytes = bt * Din * x.dtype.itemsize
    out_tile_bytes = bt * dLp * jnp.dtype(out_dtype).itemsize
    act_bytes = bt * max(dims[1:]) * 4 * 2
    need = 2 * weight_bytes + 2 * x_tile_bytes + 2 * out_tile_bytes + act_bytes
    # Scoped VMEM default is ~16 MiB (v5e) / ~32 MiB (v6e/v7x); budget explicitly
    # with headroom but never above what v7x (64 MiB physical) can give.
    vmem_limit = int(min(64 << 20, max(16 << 20, 3 * need)))

    def build_and_call(single_buffer_weights):
        in_specs = [pl.BlockSpec((bt, Din), lambda i: (i, 0))]
        for w, b in padded_params:
            if single_buffer_weights:
                # Constant index_map + single buffer: DMA'd once, half the
                # resident-weight VMEM of default double buffering.
                in_specs.append(pl.BlockSpec(w.shape, lambda i: (0, 0),
                                             pipeline_mode=pl.Buffered(1)))
                in_specs.append(pl.BlockSpec(b.shape, lambda i: (0, 0),
                                             pipeline_mode=pl.Buffered(1)))
            else:
                in_specs.append(pl.BlockSpec(w.shape, lambda i: (0, 0)))
                in_specs.append(pl.BlockSpec(b.shape, lambda i: (0, 0)))
        out_specs = pl.BlockSpec((bt, dLp), lambda i: (i, 0))
        return pl.pallas_call(
            kernel,
            out_shape=out_shape,
            grid=grid,
            in_specs=in_specs,
            out_specs=out_specs,
            cost_estimate=cost,
            compiler_params=pltpu.CompilerParams(
                dimension_semantics=("parallel",),   # batch tiles independent
                vmem_limit_bytes=vmem_limit),
        )(x, *flat_params)

    try:
        out_p = build_and_call(True)
    except Exception:
        # pipeline_mode=pl.Buffered(1) not supported on this jax version:
        # fall back to default (double-buffered) resident weights.
        out_p = build_and_call(False)

    return out_p[:, :out_dim]


# ------------------------- LiquidCell (JAX version) ------------------------

class _Wiring:
    """Minimal stand-in for an ncps wiring spec."""

    def __init__(self, units, input_dim):
        self.units = units
        self.input_dim = input_dim

    def get_config(self):
        return {"units": self.units, "input_dim": self.input_dim}


class LiquidCellJAX:
    """JAX/Pallas port of the LiquidCell base class.

    `forward` is abstract in the reference module (raises NotImplementedError);
    the implemented compute path is `apply_backbone` (the fused backbone MLP).
    `param_dtype` is the MXU-operand precision knob (default bf16; use
    jnp.float32 for exact nn.Linear numerics).
    """

    def __init__(self, wiring, activation="tanh", backbone_units=None,
                 backbone_layers=0, backbone_dropout=0.0, *, key=None,
                 param_dtype=jnp.bfloat16):
        self.wiring = wiring
        self.units = wiring.units
        self.hidden_size = wiring.units
        self.input_size = wiring.input_dim if wiring.input_dim is not None else 0
        self.activation_name = activation
        if activation not in _ACTIVATIONS:
            raise ValueError(f"Unsupported activation: {activation}")

        if backbone_units is None:
            backbone_units = []
        elif isinstance(backbone_units, int):
            backbone_units = [backbone_units] * backbone_layers
        elif len(backbone_units) == 1 and backbone_layers > 1:
            backbone_units = list(backbone_units) * backbone_layers
        self.backbone_units = backbone_units
        self.backbone_layers = backbone_layers
        self.backbone_dropout = backbone_dropout

        self.param_dtype = jnp.dtype(param_dtype)
        self.ew_dtype = _pick_elementwise_dtype(self.param_dtype)

        self.backbone_input_dim = self.input_size + self.hidden_size
        if backbone_layers > 0 and backbone_units:
            self.backbone_output_dim = backbone_units[-1]
        else:
            self.backbone_output_dim = self.backbone_input_dim

        self.params = None
        self._padded_params = None
        if backbone_layers > 0 and backbone_units:
            if key is None:
                key = jax.random.PRNGKey(0)
            self.params = self._init_backbone(key)
            self._padded_params = self._pad_params(
                self.params, self.backbone_input_dim,
                self.param_dtype, self.ew_dtype)

    def _init_backbone(self, key):
        """nn.Linear-style init: U(-1/sqrt(fan_in), +1/sqrt(fan_in)), f32 master."""
        params = []
        current = self.backbone_input_dim
        for units in self.backbone_units:
            key, kw, kb = jax.random.split(key, 3)
            bound = 1.0 / math.sqrt(current)
            w = jax.random.uniform(kw, (current, units), jnp.float32,
                                   minval=-bound, maxval=bound)
            b = jax.random.uniform(kb, (1, units), jnp.float32,
                                   minval=-bound, maxval=bound)
            params.append((w, b))
            current = units
        return params

    @staticmethod
    def _pad_params(params, input_dim, w_dtype, b_dtype):
        """Zero-pad each layer's output dim to a multiple of 128 (lane-dense
        stores, numerically exact) and match the next layer's contraction dim
        to the previous padded width.  Layer 0 keeps its contraction dim
        unpadded so the activation streams with NO wrapper-side pad copy.
        Done once at init; cast weights to the MXU dtype, biases to the
        elementwise dtype."""
        padded = []
        prev_p = input_dim
        for w, b in params:
            din, dout = w.shape
            doutp = _round_up(dout, 128)
            wp = jnp.pad(w.astype(w_dtype), ((0, prev_p - din), (0, doutp - dout)))
            bp = jnp.pad(b.astype(b_dtype), ((0, 0), (0, doutp - dout)))
            padded.append((wp, bp))
            prev_p = doutp
        return padded

    def apply_backbone(self, x, training=False):
        if self._padded_params is None:
            return x
        if x.shape[-1] != self.backbone_input_dim:
            raise ValueError(
                f"Expected input dimension {self.backbone_input_dim}, "
                f"got {x.shape[-1]}")
        if training and self.backbone_dropout > 0:
            # TODO(synk): training-mode dropout needs pltpu.prng_random_bits
            # masking in-kernel; refuse rather than silently skip it.
            raise NotImplementedError(
                "backbone_dropout > 0 in training mode is not implemented")
        # TODO(synk): for the recurrent hot path (forward() inside a time loop),
        # fold the time axis into the kernel as a leading "arbitrary" grid axis
        # so the weights are DMA'd into VMEM once per sequence, not per step.
        return backbone_forward_pallas(
            x, self._padded_params, self.backbone_output_dim,
            activation=self.activation_name,
            mxu_dtype=self.param_dtype, ew_dtype=self.ew_dtype)

    def forward(self, x, state, time=1.0):
        # TODO(synk): abstract in the reference module (raises NotImplementedError).
        raise NotImplementedError()

    def get_config(self):
        return {"wiring": self.wiring.get_config(),
                "activation": self.activation_name,
                "backbone_units": self.backbone_units,
                "backbone_layers": self.backbone_layers,
                "backbone_dropout": self.backbone_dropout}


# --------------------------------- main -------------------------------------

if __name__ == "__main__":
    key = jax.random.PRNGKey(0)
    k_x, k_h, k_p, k_big, k_odd = jax.random.split(key, 5)

    batch = 2
    input_size = 8
    hidden = 32
    backbone_units = [64, 64]

    wiring = _Wiring(units=hidden, input_dim=input_size)
    cell = LiquidCellJAX(wiring, activation="tanh",
                         backbone_units=backbone_units, backbone_layers=2,
                         backbone_dropout=0.0, key=k_p)

    x = jax.random.normal(k_x, (batch, input_size), jnp.float32)
    h = jax.random.normal(k_h, (batch, hidden), jnp.float32)
    # Build the x/h concat directly in bf16 so the kernel streams 2 B/elem
    # (cast fuses with the concat upstream; no standalone extra HBM pass).
    xh = jnp.concatenate([x, h], axis=-1).astype(jnp.bfloat16)   # [2, 40]

    # Small batch -> grid-free path.
    out = jax.block_until_ready(cell.apply_backbone(xh))          # [2, 64]
    assert out.shape == (batch, cell.backbone_output_dim)
    assert out.dtype == jnp.bfloat16

    # Reference mirroring the kernel's precision choices (tight-ish check).
    ew = cell.ew_dtype

    def ref_backbone(z):
        h_ = z.astype(jnp.bfloat16)
        n = len(cell.params)
        for i, (w, b) in enumerate(cell.params):
            y = jnp.dot(h_, w.astype(jnp.bfloat16),
                        preferred_element_type=jnp.float32)
            if i < n - 1:
                y = jnp.tanh(y.astype(ew) + b.astype(ew))
                h_ = y.astype(jnp.bfloat16)
            else:
                h_ = y + b.astype(ew).astype(jnp.float32)
        return h_

    ref = ref_backbone(xh)
    assert jnp.allclose(out.astype(jnp.float32), ref.astype(jnp.float32),
                        atol=5e-2, rtol=5e-2)

    # ... and the plain f32 reference (loose check; bf16 operand rounding).
    (w1, b1), (w2, b2) = cell.params
    ref_f32 = jnp.tanh(xh.astype(jnp.float32) @ w1 + b1) @ w2 + b2
    assert jnp.allclose(out.astype(jnp.float32), ref_f32, atol=1.5e-1, rtol=1.5e-1)

    # Larger batch -> gridded path: batch-tiled, VMEM-resident weights,
    # >= 2 parallel tiles (v7x megacore).
    big_batch = 512
    xh_big = jax.random.normal(k_big, (big_batch, cell.backbone_input_dim),
                               jnp.float32).astype(jnp.bfloat16)
    out_big = jax.block_until_ready(cell.apply_backbone(xh_big))
    assert out_big.shape == (big_batch, cell.backbone_output_dim)
    assert jnp.allclose(out_big.astype(jnp.float32),
                        ref_backbone(xh_big).astype(jnp.float32),
                        atol=5e-2, rtol=5e-2)

    # Non-multiple batch exercises the partial last tile (OOB rows dropped).
    odd_batch = 300
    xh_odd = jax.random.normal(k_odd, (odd_batch, cell.backbone_input_dim),
                               jnp.float32).astype(jnp.bfloat16)
    out_odd = jax.block_until_ready(cell.apply_backbone(xh_odd))
    assert out_odd.shape == (odd_batch, cell.backbone_output_dim)
    assert jnp.allclose(out_odd.astype(jnp.float32),
                        ref_backbone(xh_odd).astype(jnp.float32),
                        atol=5e-2, rtol=5e-2)

    print("KERNEL_OK")
</pallas_src>

<mosaic_0001>
module attributes {stable_mosaic.version = 11 : i64} {
  func.func @kernel(%arg0: memref<2x40xbf16, #tpu.memory_space<vmem>>, %arg1: memref<40x128xbf16, #tpu.memory_space<vmem>>, %arg2: memref<1x128xf32, #tpu.memory_space<vmem>>, %arg3: memref<128x128xbf16, #tpu.memory_space<vmem>>, %arg4: memref<1x128xf32, #tpu.memory_space<vmem>>, %arg5: memref<2x128xbf16, #tpu.memory_space<vmem>>) attributes {dimension_semantics = [], scalar_prefetch = 0 : i64, scratch_operands = 0 : i64, tpu.core_type = #tpu.core_type<tc>} {
    %c0 = arith.constant 0 : index
    %c0_0 = arith.constant 0 : index
    %0 = vector.load %arg0[%c0, %c0_0] : memref<2x40xbf16, #tpu.memory_space<vmem>>, vector<2x40xbf16>
    %c0_1 = arith.constant 0 : index
    %c0_2 = arith.constant 0 : index
    %1 = vector.load %arg1[%c0_1, %c0_2] : memref<40x128xbf16, #tpu.memory_space<vmem>>, vector<40x128xbf16>
    %cst = arith.constant dense<0.000000e+00> : vector<2x128xf32>
    %2 = tpu.matmul %0, %1, %cst {dimension_numbers = #tpu.dot_dimension_numbers<[1], [0], [0], [1], [0, 0, 1, 1], [], []>} : vector<2x40xbf16>, vector<40x128xbf16>, vector<2x128xf32> -> vector<2x128xf32>
    %c0_3 = arith.constant 0 : index
    %c0_4 = arith.constant 0 : index
    %3 = vector.load %arg2[%c0_3, %c0_4] : memref<1x128xf32, #tpu.memory_space<vmem>>, vector<1x128xf32>
    %4 = vector.broadcast %3 : vector<1x128xf32> to vector<2x128xf32>
    %5 = arith.addf %2, %4 : vector<2x128xf32>
    %6 = math.tanh %5 : vector<2x128xf32>
    %7 = arith.truncf %6 : vector<2x128xf32> to vector<2x128xbf16>
    %c0_5 = arith.constant 0 : index
    %c0_6 = arith.constant 0 : index
    %8 = vector.load %arg3[%c0_5, %c0_6] : memref<128x128xbf16, #tpu.memory_space<vmem>>, vector<128x128xbf16>
    %cst_7 = arith.constant dense<0.000000e+00> : vector<2x128xf32>
    %9 = tpu.matmul %7, %8, %cst_7 {dimension_numbers = #tpu.dot_dimension_numbers<[1], [0], [0], [1], [0, 0, 1, 1], [], []>} : vector<2x128xbf16>, vector<128x128xbf16>, vector<2x128xf32> -> vector<2x128xf32>
    %c0_8 = arith.constant 0 : index
    %c0_9 = arith.constant 0 : index
    %10 = vector.load %arg4[%c0_8, %c0_9] : memref<1x128xf32, #tpu.memory_space<vmem>>, vector<1x128xf32>
    %11 = vector.broadcast %10 : vector<1x128xf32> to vector<2x128xf32>
    %12 = arith.addf %9, %11 : vector<2x128xf32>
    %13 = arith.truncf %12 : vector<2x128xf32> to vector<2x128xbf16>
    %c0_10 = arith.constant 0 : index
    %c0_11 = arith.constant 0 : index
    %14 = vector.load %arg5[%c0_10, %c0_11] : memref<2x128xbf16, #tpu.memory_space<vmem>>, vector<2x128xbf16>
    tpu.vector_store %arg5[%c0_10, %c0_11], %13 {strides = array<i32>} : memref<2x128xbf16, #tpu.memory_space<vmem>>, vector<2x128xbf16>,
    return
  }
}

</mosaic_0001>

<bundles_post_ra>
// kernel: tpu_custom_call.1
= control target key start
LH: loop header
LB: loop body
LE: loop exit
PB: predicated region body
PF: predicated region fallthrough
CT: control target
= control target key end

     0   :  { %10 = vsyncpa [#allocation3], 0  ;;  %s538_s0 = inlined_call_operand.hbm [shape: bf16[2,40], index: 0, kind: input, shape index: {}]   ;;  %s539_s1 = inlined_call_operand.hbm [shape: bf16[40,128], index: 1, kind: input, shape index: {}]   ;;  %s540_s2 = inlined_call_operand.vmem [shape: f32[1,128], index: 2, kind: input, shape index: {}]   ;;  %s541_s3 = inlined_call_operand.hbm [shape: bf16[128,128], index: 3, kind: input, shape index: {}]   ;;  %s542_s4 = inlined_call_operand.vmem [shape: f32[1,128], index: 4, kind: input, shape index: {}]   ;;  %s543_s5 = inlined_call_operand.hbm [shape: bf16[2,128], index: 5, kind: output, shape index: {}]  }
   0x1   :  { %11 = vsyncpa [#allocation6], 0 }
   0x2   :  { %12 = vsyncpa [#allocation4], 0  ;;  %s440_s18 = smov [#allocation5]   ;;  %s346_s22 = scalar_lea.hbm %s539_s1, 320 }
   0x3   :  { %s28_s19 = sshll.u32 %s440_s18, 4  ;;  %p347_p0 = scmp.ne.s32.totalorder %s539_s1, %s346_s22  ;;  %s29_s19 = int_to_ptr.vmem [resolvable:$true] %s28_s19 }
   0x4   :  { %p350_p1 = scmp.lt.u32.totalorder %s346_s22, %s539_s1 }
   0x6   :  { %p352_p2 = pnand %p350_p1, %p347_p0 }
   0x8   :  { %355 = shalt.err (!%p352_p2)
}
   0x9   :  { %s356_s27 = scalar_lea.vmem %s29_s19, 320  ;;  %p361_p4 = scmp.lt.s32.totalorder %s29_s19, %s29_s19 }
   0xa   :  { %p357_p3 = scmp.ne.s32.totalorder %s29_s19, %s356_s27  ;;  %p362_p5 = scmp.lt.s32.totalorder %s356_s27, %s356_s27 }
   0xc   :  { %p363_p6 = por %p362_p5, %p361_p4 }
   0xe   :  { %p364_p7 = pnand %p363_p6, %p357_p3 }
  0x10   :  { %367 = shalt.err (!%p364_p7)
}
  0x11   :  { %s441_s28 = smov 64   ;;  %s442_s29 = smov 4  }
  0x12   :  { %34 = dma.hbm_to_vmem [thread:$0]  %s539_s1, 320, %s29_s19, [#allocation6], %s441_s28, %s441_s28, %s442_s29  }
  0x13   :  { %s443_s7 = smov [#allocation2]   ;;  %s444_s9 = smov [#allocation7]  }
  0x14   :  { %s19_s8 = sshll.u32 %s443_s7, 4  ;;  %s42_s10 = sshll.u32 %s444_s9, 4  ;;  %s20_s8 = int_to_ptr.vmem [resolvable:$true] %s19_s8  ;;  %s43_s10 = int_to_ptr.vmem [resolvable:$true] %s42_s10 }
  0x15   :  { %s368_s13 = scalar_lea.hbm %s538_s0, 16 }
  0x16   :  { %p369_p8 = scmp.ne.s32.totalorder %s538_s0, %s368_s13  ;;  %p372_p9 = scmp.lt.u32.totalorder %s368_s13, %s538_s0 }
  0x18   :  { %p374_p10 = pnand %p372_p9, %p369_p8 }
  0x1a   :  { %377 = shalt.err (!%p374_p10)
}
  0x1b   :  { %s378_s1 = scalar_lea.vmem %s20_s8, 16  ;;  %s382_s18 = scalar_lea.vmem %s20_s8, 32 }
  0x1c   :  { %p379_p11 = scmp.ne.s32.totalorder %s20_s8, %s378_s1  ;;  %p383_p12 = scmp.lt.s32.totalorder %s20_s8, %s20_s8 }
  0x1d   :  { %p384_p13 = scmp.lt.s32.totalorder %s382_s18, %s378_s1 }
  0x1f   :  { %p385_p0 = por %p384_p13, %p383_p12 }
  0x21   :  { %p386_p1 = pnand %p385_p0, %p379_p11 }
  0x23   :  { %389 = shalt.err (!%p386_p1)
}
  0x24   :  { %22 = dma.hbm_to_vmem [thread:$0]  %s538_s0, 16, %s20_s8, [#allocation3]  }
  0x25   :  { %s390_s23 = scalar_lea.hbm %s541_s3, 1024 }
  0x26   :  { %p391_p2 = scmp.ne.s32.totalorder %s541_s3, %s390_s23  ;;  %p394_p3 = scmp.lt.u32.totalorder %s390_s23, %s541_s3 }
  0x28   :  { %p396_p4 = pnand %p394_p3, %p391_p2 }
  0x2a   :  { %399 = shalt.err (!%p396_p4)
}
  0x2b   :  { %s400_s30 = scalar_lea.vmem %s43_s10, 1024  ;;  %p405_p6 = scmp.lt.s32.totalorder %s43_s10, %s43_s10 }
  0x2c   :  { %p401_p5 = scmp.ne.s32.totalorder %s43_s10, %s400_s30  ;;  %p406_p7 = scmp.lt.s32.totalorder %s400_s30, %s400_s30 }
  0x2e   :  { %p407_p8 = por %p406_p7, %p405_p6 }
  0x30   :  { %p408_p9 = pnand %p407_p8, %p401_p5 }
  0x32   :  { %411 = shalt.err (!%p408_p9)
}
  0x33   :  { %48 = dma.hbm_to_vmem [thread:$0]  %s541_s3, 1024, %s43_s10, [#allocation6], %s441_s28, %s441_s28, %s442_s29  }
  0x34   :  { %434 = dma.done.wait [#allocation3], 16  }
  0x35   :  { %435 = vsyncadd [#allocation3], 4294967280 }
  0x36   :  { %436 = dma.done.wait [#allocation6], 1344  }
  0x37   :  { %437 = vsyncadd [#allocation6], 4294965952  ;;  %v445_v0 = vmov 0.0   ;;  %vm446_vm0 = vmmov 0   ;;  %v333_v1 = vld [vmem:[#allocation5] sm:$0xff]   ;;  %v334_v2 = vld [vmem:[#allocation5 + $0x8] sm:$0xff]  }
  0x38   :  { %295 = vmatprep.subr.bf16.mxu0 %v445_v0  ;;  %301 = vmatprep.mubr.msk.bf16.mxu0 %vm446_vm0, %v445_v0  ;;  %v335_v3 = vld [vmem:[#allocation5 + $0x10] ss:$0 sps:$4 sm:$0xff]   ;;  %v336_v4 = vld [vmem:[#allocation7] sm:$0xff]   ;;  %vm93_vm1 = vcmask 1043456   ;;  %v337_v5 = vld [vmem:[#allocation7 + $0x8] sm:$0xff]   ;;  %vm89_vm2 = vcmask 326656  }
  0x39   :  { %305 = vmatprep.subr.bf16.mxu1 %v445_v0  ;;  %321 = vmatprep.mubr.msk.bf16.mxu1 %vm446_vm0, %v445_v0  ;;  %v95_v6 = vsel %vm93_vm1, %v335_v3, 0  ;;  %v338_v7 = vld [vmem:[#allocation7 + $0x10] sm:$0xff]   ;;  %v61_v8 = vld [vmem:[#allocation2] sm:$0x1]  ;;  %v339_v9 = vld [vmem:[#allocation7 + $0x18] sm:$0xff]   ;;  %s447_s8 = smov [#allocation8]  }
  0x3a   :  { %296 = vmatpush3.bf16.msra.mxu0 %v333_v1  ;;  %306 = vmatpush3.bf16.msra.mxu1 %v336_v4  ;;  %v340_v10 = vld [vmem:[#allocation7 + $0x20] sm:$0xff]   ;;  %v341_v11 = vld [vmem:[#allocation7 + $0x28] sm:$0xff]   ;;  %v342_v12 = vld [vmem:[#allocation7 + $0x30] sm:$0xff]   ;;  %s258_s9 = sshll.u32 %s447_s8, 4  ;;  %s259_s9 = int_to_ptr.vmem [resolvable:$true] %s258_s9 }
  0x3b   :  { %297 = vmatprep.subr.bf16.mxu0 %v445_v0  ;;  %307 = vmatprep.subr.bf16.mxu1 %v445_v0  ;;  %v343_v13 = vld [vmem:[#allocation7 + $0x38] sm:$0xff]   ;;  %v268_v14 = vld [vmem:[%s540_s2] ss:$0 sm:$0xff]  ;;  %s412_s2 = scalar_lea.vmem %s259_s9, 16  ;;  %s416_s10 = scalar_lea.vmem %s259_s9, 32 }
  0x3c   :  { %v273_v22 = vld [vmem:[%s542_s4] ss:$0 sm:$0xff]  ;;  %p413_p10 = scmp.ne.s32.totalorder %s259_s9, %s412_s2  ;;  %p417_p11 = scmp.lt.s32.totalorder %s259_s9, %s259_s9 }
  0x3d   :  { %p418_p12 = scmp.lt.s32.totalorder %s416_s10, %s412_s2 }
  0x3e   :  { %298 = vmatpush3.bf16.msra.mxu0 %v334_v2  ;;  %308 = vmatpush3.bf16.msra.mxu1 %v337_v5 }
  0x3f   :  { %299 = vmatprep.subr.bf16.mxu0 %v445_v0  ;;  %309 = vmatprep.subr.bf16.mxu1 %v445_v0  ;;  %p419_p13 = por %p418_p12, %p417_p11 }
  0x41   :  { %p420_p0 = pnand %p419_p13, %p413_p10 }
  0x42   :  { %300 = vmatpush3.bf16.msra.mxu0 %v95_v6  ;;  %310 = vmatpush3.bf16.msra.mxu1 %v338_v7 }
  0x43   :  { %311 = vmatprep.subr.bf16.mxu1 %v445_v0 }
  0x45   :  { %302 = vmatmul.mubr.msk.bf16.vlgmr.msra.gmra.mrb[0].mxu0 %vm89_vm2, %v61_v8 }
  0x46   :  { %312 = vmatpush3.bf16.msra.mxu1 %v339_v9 }
  0x47   :  { %313 = vmatprep.subr.bf16.mxu1 %v445_v0 }
  0x4a   :  { %314 = vmatpush3.bf16.msra.mxu1 %v340_v10 }
  0x4b   :  { %315 = vmatprep.subr.bf16.mxu1 %v445_v0 }
  0x4e   :  { %316 = vmatpush3.bf16.msra.mxu1 %v341_v11 }
  0x4f   :  { %317 = vmatprep.subr.bf16.mxu1 %v445_v0 }
  0x52   :  { %318 = vmatpush3.bf16.msra.mxu1 %v342_v12 }
  0x53   :  { %319 = vmatprep.subr.bf16.mxu1 %v445_v0 }
  0x56   :  { %320 = vmatpush3.bf16.msra.mxu1 %v343_v13 }
 0x118   :  { %v131_v15 = vpop.f32.mrb[0].mxu0 }
 0x119   :  { %v132_v16 = vadd.f32 %v268_v14, %v131_v15  ;;  %v303_v17 = vpop.f32.mrb[1].mxu0 }
 0x11a   :  { %v134_v18 = vpop.f32.mrb[2].mxu0 }
 0x11b   :  { %344 = vtanh.f32 %v132_v16  ;;  %v304_v19 = vpop.f32.mrb[3].mxu0 }
 0x125   :  { %v345_v20 = vpop.eup %344 }
 0x126   :  { %v138_v21 = vpack.c.bf16 %v345_v20, %v345_v20 }
 0x128   :  { %322 = vmatmul.mubr.bf16.vlgmr.msra.gmra.mrb[0].mxu1 %v138_v21 }
 0x1fb   :  { %v244_v23 = vpop.f32.mrb[0].mxu1 }
 0x1fc   :  { %v245_v24 = vadd.f32 %v273_v22, %v244_v23  ;;  %v323_v25 = vpop.f32.mrb[1].mxu1 }
 0x1fd   :  { %v247_v26 = vpop.f32.mrb[2].mxu1 }
 0x1fe   :  { %v250_v27 = vpack.c.bf16 %v245_v24, %v245_v24  ;;  %v324_v28 = vpop.f32.mrb[3].mxu1 }
 0x200   :  { %251 = vst [vmem:[#allocation8] sm:$0x1] %v250_v27 }
 0x201   :  { %423 = shalt.err (!%p420_p0)
}
 0x202   :  { %s424_s12 = scalar_lea.hbm %s543_s5, 16 }
 0x203   :  { %p425_p1 = scmp.ne.s32.totalorder %s543_s5, %s424_s12  ;;  %p428_p2 = scmp.lt.u32.totalorder %s424_s12, %s543_s5 }
 0x205   :  { %p430_p3 = pnand %p428_p2, %p425_p1 }
 0x207   :  { %433 = shalt.err (!%p430_p3)
}
 0x208   :  { %261 = dma.vmem_to_hbm [thread:$0]  %s259_s9, 16, %s543_s5, [#allocation4]  }
 0x209   :  { %438 = dma.done.wait [#allocation4], 16  }
 0x20a   :  { %439 = vsyncadd [#allocation4], 4294967280 }
 0x20b   :  { %265 = vsyncpa [#allocation3], 1 }
 0x20c   :  { %266 = vsyncpa [#allocation6], 1 }
 0x20d   :  { %267 = vsyncpa [#allocation4], 1 }

</bundles_post_ra>
